<compile_context>
chip_gen: v7x
topology: tpu7x:2x2x1
jax: 0.10.0
libtpu: 0.0.40
codegen_flags: <defaults>
</compile_context>

<pallas_src>
import functools

import jax
import jax.numpy as jnp
from jax.experimental import pallas as pl
from jax.experimental.pallas import tpu as pltpu

EPS = 1e-5  # torch.nn.LayerNorm default


def prenorm_linear_kernel(x_ref, w_ref, b_ref, o_ref):
    # x_ref: (TM, D)  rows of the flattened (B*N, D) input
    # w_ref: (D, TN)  affine-folded weight tile (bf16 or f32)
    # b_ref: (1, TN)  affine-folded bias tile (f32)
    # o_ref: (TM, TN)
    x = x_ref[...].astype(jnp.float32)

    # LayerNorm statistics (biased variance, like torch.nn.LayerNorm), in f32.
    mean = jnp.mean(x, axis=-1, keepdims=True)
    xc = x - mean
    var = jnp.mean(xc * xc, axis=-1, keepdims=True)
    normed = xc * jax.lax.rsqrt(var + EPS)

    # Affine + Linear folded into (W', b'); single MXU matmul, f32 accumulate.
    y = jnp.dot(normed.astype(w_ref.dtype), w_ref[...],
                preferred_element_type=jnp.float32)
    o_ref[...] = (y + b_ref[...]).astype(o_ref.dtype)


def _round_up(v, m):
    return (v + m - 1) // m * m


def _pick_block_cols(d, do_pad, wbytes, requested):
    if requested is not None:
        assert requested % 128 == 0 and do_pad % requested == 0
        return requested
    # Keep the double-buffered weight tile under ~8 MiB (safe within v7x's
    # 64 MiB VMEM while leaving room for x/out tiles).
    budget = 8 * 1024 * 1024
    for cand in (do_pad, 4096, 2048, 1024, 512, 256, 128):
        if cand <= do_pad and do_pad % cand == 0 and 2 * d * cand * wbytes <= budget:
            return cand
    return 128


@functools.partial(jax.jit,
                   static_argnames=("block_rows", "block_cols", "matmul_dtype"))
def prenorm(x, gamma, beta, w, b, *, block_rows=256, block_cols=None,
            matmul_dtype=jnp.bfloat16):
    """x: [B, N, D] -> fn(LayerNorm(x)) : [B, N, DO], fn = Linear(D, DO)."""
    B, N, D = x.shape
    DO = w.shape[1]
    rows = B * N
    f32 = jnp.float32

    # Fold the LayerNorm affine into the linear layer (done once at trace time):
    #   (xc*inv*gamma + beta) @ W + b == (xc*inv) @ (gamma[:,None]*W) + (beta@W + b)
    w_f = gamma.astype(f32)[:, None] * w.astype(f32)
    b_f = beta.astype(f32) @ w.astype(f32) + b.astype(f32)
    if matmul_dtype is not None:
        w_f = w_f.astype(matmul_dtype)

    # Lane-dense output: pad output columns to a multiple of 128 (zeros).
    DO_pad = _round_up(DO, 128)
    if DO_pad != DO:
        w_f = jnp.pad(w_f, ((0, 0), (0, DO_pad - DO)))
        b_f = jnp.pad(b_f, ((0, DO_pad - DO),))
    b2 = b_f.reshape(1, DO_pad)

    # Row tiling: big tiles, cdiv + zero padding (no divisibility requirement).
    # Note: D itself is kept as the full (untiled) last dim; for production it
    # should be a multiple of 128 for best layout, any D is still correct.
    tm = _round_up(min(block_rows, _round_up(rows, 8)), 8)
    rows_pad = _round_up(rows, tm)
    x2 = x.reshape(rows, D)
    if rows_pad != rows:
        x2 = jnp.pad(x2, ((0, rows_pad - rows), (0, 0)))

    wbytes = jnp.dtype(w_f.dtype).itemsize
    xbytes = jnp.dtype(x.dtype).itemsize
    obytes = xbytes
    tn = _pick_block_cols(D, DO_pad, wbytes, block_cols)

    # Double-buffered tiles + in-kernel f32 temporaries, with headroom.
    vmem_est = (2 * (tm * D * xbytes + tm * tn * obytes + D * tn * wbytes + tn * 4)
                + 4 * tm * (D + tn) * 4)
    vmem_limit = int(min(64 * 1024 * 1024, max(32 * 1024 * 1024, 2 * vmem_est)))

    cost = pl.CostEstimate(
        flops=2 * rows_pad * D * DO_pad,
        transcendentals=rows_pad,  # one rsqrt per row
        bytes_accessed=(rows_pad * D * xbytes + rows_pad * DO_pad * obytes
                        + D * DO_pad * wbytes),
    )

    # For production row counts the row axis has >= 2 steps, so both parallel
    # axes can shard across the 2 TensorCores on v7x.
    grid = (rows_pad // tm, DO_pad // tn)

    out = pl.pallas_call(
        prenorm_linear_kernel,
        out_shape=jax.ShapeDtypeStruct((rows_pad, DO_pad), x.dtype),
        grid_spec=pltpu.PrefetchScalarGridSpec(
            num_scalar_prefetch=0,
            grid=grid,
            in_specs=[
                pl.BlockSpec((tm, D), lambda i, j: (i, 0)),
                pl.BlockSpec((D, tn), lambda i, j: (0, j)),
                pl.BlockSpec((1, tn), lambda i, j: (0, j)),
            ],
            out_specs=pl.BlockSpec((tm, tn), lambda i, j: (i, j)),
        ),
        compiler_params=pltpu.CompilerParams(
            dimension_semantics=("parallel", "parallel"),
            vmem_limit_bytes=vmem_limit,
        ),
        cost_estimate=cost,
    )(x2, w_f, b2)

    return out[:rows, :DO].reshape(B, N, DO)


def prenorm_reference(x, gamma, beta, w, b):
    x32 = x.astype(jnp.float32)
    mean = jnp.mean(x32, axis=-1, keepdims=True)
    var = jnp.mean((x32 - mean) ** 2, axis=-1, keepdims=True)
    normed = (x32 - mean) * jax.lax.rsqrt(var + EPS) * gamma + beta
    return (normed @ w + b).astype(x.dtype)


if __name__ == "__main__":
    key = jax.random.PRNGKey(0)
    B, N, D = 2, 8, 32  # batch=2, seq=8, dim=32

    kx, kw, kb, kg, kbe = jax.random.split(key, 5)
    x = jax.random.normal(kx, (B, N, D), dtype=jnp.float32)

    # Non-trivial LayerNorm affine to exercise the affine-fold path.
    gamma = 1.0 + 0.1 * jax.random.normal(kg, (D,), dtype=jnp.float32)
    beta = 0.1 * jax.random.normal(kbe, (D,), dtype=jnp.float32)
    # fn = Linear(dim, dim) with small random weights.
    w = 0.02 * jax.random.normal(kw, (D, D), dtype=jnp.float32)
    b = 0.02 * jax.random.normal(kb, (D,), dtype=jnp.float32)

    ref = prenorm_reference(x, gamma, beta, w, b)

    # Full-precision matmul path (tight tolerance).
    out_f32 = jax.block_until_ready(
        prenorm(x, gamma, beta, w, b, matmul_dtype=jnp.float32))
    assert out_f32.shape == (B, N, D)
    assert jnp.allclose(out_f32, ref, atol=1e-5, rtol=1e-5), "f32 mismatch vs reference"

    # Default fast path: bf16 MXU operands, f32 accumulation (bf16 tolerance).
    out_bf16 = jax.block_until_ready(prenorm(x, gamma, beta, w, b))
    assert out_bf16.shape == (B, N, D)
    assert jnp.allclose(out_bf16, ref, atol=5e-2, rtol=5e-2), "bf16 mismatch vs reference"

    print("KERNEL_OK")
</pallas_src>

<mosaic_0001>
module attributes {stable_mosaic.version = 11 : i64} {
  func.func @prenorm_linear_kernel(%arg0: i32, %arg1: i32, %arg2: memref<16x32xf32, #tpu.memory_space<vmem>>, %arg3: memref<32x128xf32, #tpu.memory_space<vmem>>, %arg4: memref<1x128xf32, #tpu.memory_space<vmem>>, %arg5: memref<16x128xf32, #tpu.memory_space<vmem>>) attributes {dimension_semantics = [#tpu.dimension_semantics<parallel>, #tpu.dimension_semantics<parallel>], iteration_bounds = array<i64: 1, 1>, scalar_prefetch = 0 : i64, scratch_operands = 0 : i64, tpu.core_type = #tpu.core_type<tc>, window_params = [{transform_indices = @transform_0, window_bounds = array<i64: 16, 32>}, {transform_indices = @transform_1, window_bounds = array<i64: 32, 128>}, {transform_indices = @transform_2, window_bounds = array<i64: 1, 128>}, {transform_indices = @transform_3, window_bounds = array<i64: 16, 128>}]} {
    %c0 = arith.constant 0 : index
    %c0_0 = arith.constant 0 : index
    %0 = vector.load %arg2[%c0, %c0_0] : memref<16x32xf32, #tpu.memory_space<vmem>>, vector<16x32xf32>
    %cst = arith.constant dense<0.000000e+00> : vector<16xf32>
    %1 = vector.multi_reduction <add>, %0, %cst [1] : vector<16x32xf32> to vector<16xf32>
    %2 = vector.shape_cast %1 : vector<16xf32> to vector<16x1xf32>
    %cst_1 = arith.constant 3.200000e+01 : f32
    %3 = vector.broadcast %cst_1 : f32 to vector<16x1xf32>
    %4 = arith.divf %2, %3 : vector<16x1xf32>
    %5 = vector.broadcast %4 : vector<16x1xf32> to vector<16x32xf32>
    %6 = arith.subf %0, %5 : vector<16x32xf32>
    %7 = arith.mulf %6, %6 : vector<16x32xf32>
    %cst_2 = arith.constant dense<0.000000e+00> : vector<16xf32>
    %8 = vector.multi_reduction <add>, %7, %cst_2 [1] : vector<16x32xf32> to vector<16xf32>
    %9 = vector.shape_cast %8 : vector<16xf32> to vector<16x1xf32>
    %cst_3 = arith.constant 3.200000e+01 : f32
    %10 = vector.broadcast %cst_3 : f32 to vector<16x1xf32>
    %11 = arith.divf %9, %10 : vector<16x1xf32>
    %cst_4 = arith.constant 9.99999974E-6 : f32
    %12 = vector.broadcast %cst_4 : f32 to vector<16x1xf32>
    %13 = arith.addf %11, %12 : vector<16x1xf32>
    %14 = math.rsqrt %13 : vector<16x1xf32>
    %15 = vector.broadcast %14 : vector<16x1xf32> to vector<16x32xf32>
    %16 = arith.mulf %6, %15 : vector<16x32xf32>
    %c0_5 = arith.constant 0 : index
    %c0_6 = arith.constant 0 : index
    %17 = vector.load %arg3[%c0_5, %c0_6] : memref<32x128xf32, #tpu.memory_space<vmem>>, vector<32x128xf32>
    %cst_7 = arith.constant dense<0.000000e+00> : vector<16x128xf32>
    %18 = tpu.matmul %16, %17, %cst_7 {dimension_numbers = #tpu.dot_dimension_numbers<[1], [0], [0], [1], [0, 0, 1, 1], [], []>} : vector<16x32xf32>, vector<32x128xf32>, vector<16x128xf32> -> vector<16x128xf32>
    %c0_8 = arith.constant 0 : index
    %c0_9 = arith.constant 0 : index
    %19 = vector.load %arg4[%c0_8, %c0_9] : memref<1x128xf32, #tpu.memory_space<vmem>>, vector<1x128xf32>
    %20 = vector.broadcast %19 : vector<1x128xf32> to vector<16x128xf32>
    %21 = arith.addf %18, %20 : vector<16x128xf32>
    %c0_10 = arith.constant 0 : index
    %c0_11 = arith.constant 0 : index
    %22 = vector.load %arg5[%c0_10, %c0_11] : memref<16x128xf32, #tpu.memory_space<vmem>>, vector<16x128xf32>
    tpu.vector_store %arg5[%c0_10, %c0_11], %21 {strides = array<i32>} : memref<16x128xf32, #tpu.memory_space<vmem>>, vector<16x128xf32>,
    return
  }
  func.func @transform_0(%arg0: i32, %arg1: i32) -> (i32, i32) {
    %c0_i32 = arith.constant 0 : i32
    %c0_i32_0 = arith.constant 0 : i32
    return %arg0, %c0_i32 : i32, i32
  }
  func.func @transform_1(%arg0: i32, %arg1: i32) -> (i32, i32) {
    %c0_i32 = arith.constant 0 : i32
    %c0_i32_0 = arith.constant 0 : i32
    return %c0_i32, %arg1 : i32, i32
  }
  func.func @transform_2(%arg0: i32, %arg1: i32) -> (i32, i32) {
    %c0_i32 = arith.constant 0 : i32
    %c0_i32_0 = arith.constant 0 : i32
    return %c0_i32, %arg1 : i32, i32
  }
  func.func @transform_3(%arg0: i32, %arg1: i32) -> (i32, i32) {
    %c0_i32 = arith.constant 0 : i32
    return %arg0, %arg1 : i32, i32
  }
}

</mosaic_0001>

<bundles_post_ra>
// kernel: prenorm.1
= control target key start
LH: loop header
LB: loop body
LE: loop exit
PB: predicated region body
PF: predicated region fallthrough
CT: control target
= control target key end

     0   :  { %vm16_vm0 = vcmask 261120   ;;  %s227_s0 = inlined_call_operand.vmem [shape: f32[16,32], index: 0, kind: input, shape index: {}]   ;;  %s228_s1 = inlined_call_operand.vmem [shape: f32[32,128], index: 1, kind: input, shape index: {}]   ;;  %s229_s2 = inlined_call_operand.vmem [shape: f32[1,128], index: 2, kind: input, shape index: {}]   ;;  %s230_s3 = inlined_call_operand.vmem [shape: f32[16,128], index: 3, kind: output, shape index: {}]  }
   0x1   :  { %v14_v0 = vld [vmem:[%s227_s0] sm:$0xff]  ;;  %v15_v1 = vld [vmem:[%s227_s0 + $0x8] sm:$0xff]  ;;  %v46_v16 = vld [vmem:[%s228_s1 + $0x10] sm:$0xff] }
   0x2   :  { %v17_v2 = vsel %vm16_vm0, %v14_v0, 0.0  ;;  %v20_v3 = vsel %vm16_vm0, %v15_v1, 0.0  ;;  %v44_v14 = vld [vmem:[%s228_s1] sm:$0xff]  ;;  %v45_v15 = vld [vmem:[%s228_s1 + $0x8] sm:$0xff]  ;;  %v47_v18 = vld [vmem:[%s228_s1 + $0x18] sm:$0xff] }
   0x3   :  { %18 = vadd.xlane.f32.xlu0 %v17_v2  ;;  %v162_v17 = vpack.c.bf16 %v45_v15, %v44_v14  ;;  %v166_v19 = vpack.c.bf16 %v47_v18, %v46_v16  ;;  %v142_v30 = vld [vmem:[%s229_s2] ss:$0 sm:$0xff] }
   0x5   :  { %163 = vmatprep.subr.bf16.mxu0 %v162_v17 }
   0x6   :  { %165 = vmatpush3.bf16.msra.mxu0 %v162_v17 }
   0x7   :  { %21 = vadd.xlane.f32.xlu0 %v20_v3  ;;  %167 = vmatprep.subr.bf16.mxu0 %v166_v19 }
   0xa   :  { %169 = vmatpush3.bf16.msra.mxu0 %v166_v19 }
  0x90   :  { %v19_v4 = vpop.xlane.xlu0 %18 }
  0x91   :  { %v24_v5 = vmul.f32 0.03125, %v19_v4 }
  0x93   :  { %v26_v6 = vsub.f32 %v14_v0, %v24_v5 }
  0x94   :  { %v22_v7 = vpop.xlane.xlu0 %21 }
  0x95   :  { %v25_v8 = vmul.f32 0.03125, %v22_v7  ;;  %v28_v9 = vmul.f32 %v26_v6, %v26_v6 }
  0x97   :  { %v27_v10 = vsub.f32 %v15_v1, %v25_v8  ;;  %v30_v11 = vsel %vm16_vm0, %v28_v9, 0.0 }
  0x98   :  { %31 = vadd.xlane.f32.xlu1 %v30_v11 }
  0x99   :  { %v29_v12 = vmul.f32 %v27_v10, %v27_v10 }
  0x9b   :  { %v33_v13 = vsel %vm16_vm0, %v29_v12, 0.0 }
  0x9c   :  { %34 = vadd.xlane.f32.xlu1 %v33_v13 }
 0x125   :  { %v32_v20 = vpop.xlane.xlu1 %31 }
 0x126   :  { %v36_v21 = vmul.f32 0.03125, %v32_v20 }
 0x128   :  { %v38_v22 = vadd.f32 1e-05, %v36_v21 }
 0x129   :  { %v35_v23 = vpop.xlane.xlu1 %34 }
 0x12a   :  { %170 = vrsqrt.f32 %v38_v22  ;;  %v37_v24 = vmul.f32 0.03125, %v35_v23 }
 0x12c   :  { %v39_v25 = vadd.f32 1e-05, %v37_v24 }
 0x12e   :  { %172 = vrsqrt.f32 %v39_v25 }
 0x134   :  { %v171_v26 = vpop.eup %170 }
 0x135   :  { %v42_v27 = vmul.f32 %v171_v26, %v26_v6 }
 0x137   :  { %159 = vmatprep.mubr.msk.f32.mxu0 %vm16_vm0, %v42_v27 }
 0x138   :  { %v173_v28 = vpop.eup %172 }
 0x139   :  { %v43_v29 = vmul.f32 %v173_v28, %v27_v10 }
 0x13b   :  { %160 = vmatmul.mubr.msk.f32.vlgmr.msra.gmra.mrb[0].mxu0 %vm16_vm0, %v43_v29 }
 0x20e   :  { %v161_v31 = vpop.f32.mrb[0].mxu0 }
 0x20f   :  { %v133_v32 = vadd.f32 %v161_v31, %v142_v30  ;;  %v127_v33 = vpop.f32.mrb[1].mxu0 }
 0x210   :  { %v128_v34 = vadd.f32 %v142_v30, %v127_v33 }
 0x211   :  { %137 = vst [vmem:[%s230_s3 + $0x8] sm:$0xff] %v133_v32 }
 0x212   :  { %136 = vst [vmem:[%s230_s3] sm:$0xff] %v128_v34 }

</bundles_post_ra>
